<compile_context>
chip_gen: v7x
topology: tpu7x:2x2x1
jax: 0.10.0
libtpu: 0.0.40
codegen_flags: <defaults>
</compile_context>

<pallas_src>
import numpy as np
import jax
import jax.numpy as jnp
from jax.experimental import pallas as pl
from jax.experimental.pallas import tpu as pltpu

MIN_ACTION, MAX_ACTION = -1.0, 1.0
MIN_LOG_STD, MAX_LOG_STD = -20.0, 2.0
EPSILON_NOISE = 0.2
NOISE_CLIP_MIN, NOISE_CLIP_MAX = -0.5, 0.5


# ------------------------------- kernel ------------------------------------
def _make_actor_kernel(add_noise: bool, action_dim: int):
    A = action_dim

    def kernel(state_ref, w1_ref, b1_ref, w2_ref, b2_ref, w3_ref, b3_ref,
               wmu_ref, bmu_ref, std_ref, eps_ref, *rest):
        if add_noise:
            extra_ref, out_ref = rest
        else:
            (out_ref,) = rest

        wdt = w1_ref.dtype  # f32 or bf16 weights; accumulate in f32 on the MXU
        x = state_ref[...].astype(wdt)

        # embed: Linear -> ReLU -> Linear -> ReLU -> Linear -> ReLU
        h = jnp.maximum(
            jnp.dot(x, w1_ref[...], preferred_element_type=jnp.float32)
            + b1_ref[...].astype(jnp.float32), 0.0)
        h = jnp.maximum(
            jnp.dot(h.astype(wdt), w2_ref[...], preferred_element_type=jnp.float32)
            + b2_ref[...].astype(jnp.float32), 0.0)
        h = jnp.maximum(
            jnp.dot(h.astype(wdt), w3_ref[...], preferred_element_type=jnp.float32)
            + b3_ref[...].astype(jnp.float32), 0.0)

        # mu head
        mu = (jnp.dot(h.astype(wdt), wmu_ref[...], preferred_element_type=jnp.float32)
              + bmu_ref[...].astype(jnp.float32))

        # dist = Normal(mu, std);  rsample = mu + std * eps
        action = mu + std_ref[...] * eps_ref[...]
        if add_noise:
            action = action + extra_ref[...]        # pre-clipped exploration noise
        action = jnp.clip(action, MIN_ACTION, MAX_ACTION)

        # Fused output slab: [ action | mu ] in one (tb, 2A) block.
        out_ref[:, :A] = action
        out_ref[:, A:] = mu

    return kernel


# ------------------------------- wrapper ------------------------------------
def _round_up(x, m):
    return ((x + m - 1) // m) * m


def _choose_tb(batch, max_tb):
    """Largest sensible batch tile (multiple of 8) with >=2 grid steps when
    possible so ("parallel",) can shard the batch across TensorCores."""
    tb = min(max_tb, _round_up(batch, 8))
    if -(-batch // tb) < 2 and tb > 8:          # ceil-div without tracing
        tb = max(8, _round_up(-(-batch // 2), 8))
    return tb


def _vmem_limit_bytes(S, H, A, tb, weight_bytes):
    weights = (S * H + 2 * H * H + H * A + 3 * H + 2 * A) * weight_bytes
    tiles = tb * (S + 2 * A + 2 * A) * 4
    need = 2 * (weights + tiles) + (2 << 20)    # double-buffering + headroom
    return int(min(max(need, 32 << 20), 64 << 20))


def actor_forward(params, state, eps, add_noise=False, noise=None, max_tb=512):
    """Pallas implementation of Actor.forward.

    Returns (action, (mu, std)) where (mu, std) are the Normal dist params
    and std has shape (action_dim,).  `eps` is the N(0,1) sample used by
    dist.rsample(); `noise` (when add_noise=True) is the raw N(0, eps_noise)
    exploration noise — both supplied by the caller so the kernel stays
    deterministic."""
    B, S = state.shape
    H = params["w1"].shape[1]
    A = params["w_mu"].shape[1]

    # std = exp(clamp(log_std)) is a per-model (1, A) constant -> hoist out.
    std_row = jnp.exp(jnp.clip(params["log_std"].astype(jnp.float32),
                               MIN_LOG_STD, MAX_LOG_STD))

    tb = _choose_tb(B, max_tb)
    B_pad = _round_up(B, tb)
    pad = B_pad - B

    def _pad_rows(x):
        x = x.astype(jnp.float32)
        return jnp.pad(x, ((0, pad), (0, 0))) if pad else x

    inputs = [_pad_rows(state), params["w1"], params["b1"], params["w2"],
              params["b2"], params["w3"], params["b3"], params["w_mu"],
              params["b_mu"], std_row, _pad_rows(eps)]

    batch_tile = lambda f: pl.BlockSpec((tb, f), lambda i: (i, 0))
    full = lambda shape: pl.BlockSpec(shape, lambda i: (0, 0))

    in_specs = [
        batch_tile(S),                 # state
        full((S, H)), full((1, H)),    # w1, b1
        full((H, H)), full((1, H)),    # w2, b2
        full((H, H)), full((1, H)),    # w3, b3
        full((H, A)), full((1, A)),    # w_mu, b_mu
        full((1, A)),                  # std row (precomputed)
        batch_tile(A),                 # eps
    ]

    if add_noise:
        assert noise is not None, "add_noise=True requires explicit noise"
        extra = jnp.clip(noise.astype(jnp.float32), NOISE_CLIP_MIN, NOISE_CLIP_MAX)
        inputs.append(_pad_rows(extra))
        in_specs.append(batch_tile(A))

    weight_bytes = jnp.dtype(params["w1"].dtype).itemsize
    fused = pl.pallas_call(
        _make_actor_kernel(add_noise, A),
        out_shape=jax.ShapeDtypeStruct((B_pad, 2 * A), jnp.float32),
        grid=(B_pad // tb,),
        in_specs=in_specs,
        out_specs=pl.BlockSpec((tb, 2 * A), lambda i: (i, 0)),
        compiler_params=pltpu.CompilerParams(
            dimension_semantics=("parallel",),
            vmem_limit_bytes=_vmem_limit_bytes(S, H, A, tb, weight_bytes),
        ),
    )(*inputs)

    action = fused[:B, :A]
    mu = fused[:B, A:]
    return action, (mu, std_row[0])


# --------------------- parameter init (deterministic) ----------------------
def _linear_params(key, fan_in, fan_out, dtype=jnp.float32):
    # Mimic PyTorch nn.Linear default init: U(-1/sqrt(fan_in), 1/sqrt(fan_in)).
    kw, kb = jax.random.split(key)
    bound = 1.0 / float(np.sqrt(fan_in))
    w = jax.random.uniform(kw, (fan_in, fan_out), jnp.float32, -bound, bound)
    b = jax.random.uniform(kb, (1, fan_out), jnp.float32, -bound, bound)
    return w.astype(dtype), b.astype(jnp.float32)


def init_actor_params(key, state_dim, action_dim, hidden_dim, weight_dtype=jnp.float32):
    k1, k2, k3, k4 = jax.random.split(key, 4)
    w1, b1 = _linear_params(k1, state_dim, hidden_dim, weight_dtype)
    w2, b2 = _linear_params(k2, hidden_dim, hidden_dim, weight_dtype)
    w3, b3 = _linear_params(k3, hidden_dim, hidden_dim, weight_dtype)
    w_mu, b_mu = _linear_params(k4, hidden_dim, action_dim, weight_dtype)
    log_std = jnp.zeros((1, action_dim), jnp.float32)   # nn.Parameter(zeros)
    return dict(w1=w1, b1=b1, w2=w2, b2=b2, w3=w3, b3=b3,
                w_mu=w_mu, b_mu=b_mu, log_std=log_std)


# ------------------------------ reference ----------------------------------
def _ref_forward(params, state, eps, noise=None):
    h = jax.nn.relu(state @ params["w1"].astype(jnp.float32) + params["b1"])
    h = jax.nn.relu(h @ params["w2"].astype(jnp.float32) + params["b2"])
    h = jax.nn.relu(h @ params["w3"].astype(jnp.float32) + params["b3"])
    mu = h @ params["w_mu"].astype(jnp.float32) + params["b_mu"]
    std = jnp.exp(jnp.clip(params["log_std"], MIN_LOG_STD, MAX_LOG_STD))
    action = mu + std * eps
    if noise is not None:
        action = action + jnp.clip(noise, NOISE_CLIP_MIN, NOISE_CLIP_MAX)
    action = jnp.clip(action, MIN_ACTION, MAX_ACTION)
    return action, mu, std[0]


if __name__ == "__main__":
    B, STATE_DIM, HIDDEN_DIM, ACTION_DIM = 16, 16, 32, 8

    params = init_actor_params(jax.random.PRNGKey(0), STATE_DIM, ACTION_DIM, HIDDEN_DIM)
    k_state, k_eps, k_noise = jax.random.split(jax.random.PRNGKey(1), 3)
    state = jax.random.normal(k_state, (B, STATE_DIM), jnp.float32)
    eps = jax.random.normal(k_eps, (B, ACTION_DIM), jnp.float32)
    noise = EPSILON_NOISE * jax.random.normal(k_noise, (B, ACTION_DIM), jnp.float32)

    # 1) add_noise=False (specialized kernel, no `extra` input)
    action, (mu, std) = actor_forward(params, state, eps, add_noise=False)
    jax.block_until_ready(action)
    ref_action, ref_mu, ref_std = _ref_forward(params, state, eps)
    np.testing.assert_allclose(np.asarray(action), np.asarray(ref_action), rtol=1e-5, atol=1e-5)
    np.testing.assert_allclose(np.asarray(mu), np.asarray(ref_mu), rtol=1e-5, atol=1e-5)
    np.testing.assert_allclose(np.asarray(std), np.asarray(ref_std), rtol=1e-6, atol=1e-6)

    # 2) add_noise=True (exploration noise pre-clipped in the wrapper)
    action_n, (mu_n, std_n) = actor_forward(params, state, eps, add_noise=True, noise=noise)
    jax.block_until_ready(action_n)
    ref_action_n, ref_mu_n, _ = _ref_forward(params, state, eps, noise=noise)
    np.testing.assert_allclose(np.asarray(action_n), np.asarray(ref_action_n), rtol=1e-5, atol=1e-5)
    np.testing.assert_allclose(np.asarray(mu_n), np.asarray(ref_mu_n), rtol=1e-5, atol=1e-5)

    # 3) ragged batch (exercises wrapper padding of the batch axis)
    Bo = 13
    action_o, (mu_o, _) = actor_forward(params, state[:Bo], eps[:Bo], add_noise=False)
    jax.block_until_ready(action_o)
    np.testing.assert_allclose(np.asarray(action_o), np.asarray(ref_action[:Bo]), rtol=1e-5, atol=1e-5)
    np.testing.assert_allclose(np.asarray(mu_o), np.asarray(ref_mu[:Bo]), rtol=1e-5, atol=1e-5)

    print("KERNEL_OK")
</pallas_src>

<mosaic_0001>
module attributes {stable_mosaic.version = 11 : i64} {
  func.func @kernel(%arg0: i32, %arg1: memref<8x16xf32, #tpu.memory_space<vmem>>, %arg2: memref<16x32xf32, #tpu.memory_space<vmem>>, %arg3: memref<1x32xf32, #tpu.memory_space<vmem>>, %arg4: memref<32x32xf32, #tpu.memory_space<vmem>>, %arg5: memref<1x32xf32, #tpu.memory_space<vmem>>, %arg6: memref<32x32xf32, #tpu.memory_space<vmem>>, %arg7: memref<1x32xf32, #tpu.memory_space<vmem>>, %arg8: memref<32x8xf32, #tpu.memory_space<vmem>>, %arg9: memref<1x8xf32, #tpu.memory_space<vmem>>, %arg10: memref<1x8xf32, #tpu.memory_space<vmem>>, %arg11: memref<8x8xf32, #tpu.memory_space<vmem>>, %arg12: memref<8x16xf32, #tpu.memory_space<vmem>>) attributes {dimension_semantics = [#tpu.dimension_semantics<parallel>], iteration_bounds = array<i64: 2>, scalar_prefetch = 0 : i64, scratch_operands = 0 : i64, tpu.core_type = #tpu.core_type<tc>, window_params = [{transform_indices = @transform_0, window_bounds = array<i64: 8, 16>}, {pipeline_mode = #tpu.pipeline_mode<synchronous>, transform_indices = @transform_1, window_bounds = array<i64: 16, 32>}, {pipeline_mode = #tpu.pipeline_mode<synchronous>, transform_indices = @transform_2, window_bounds = array<i64: 1, 32>}, {pipeline_mode = #tpu.pipeline_mode<synchronous>, transform_indices = @transform_3, window_bounds = array<i64: 32, 32>}, {pipeline_mode = #tpu.pipeline_mode<synchronous>, transform_indices = @transform_4, window_bounds = array<i64: 1, 32>}, {pipeline_mode = #tpu.pipeline_mode<synchronous>, transform_indices = @transform_5, window_bounds = array<i64: 32, 32>}, {pipeline_mode = #tpu.pipeline_mode<synchronous>, transform_indices = @transform_6, window_bounds = array<i64: 1, 32>}, {pipeline_mode = #tpu.pipeline_mode<synchronous>, transform_indices = @transform_7, window_bounds = array<i64: 32, 8>}, {pipeline_mode = #tpu.pipeline_mode<synchronous>, transform_indices = @transform_8, window_bounds = array<i64: 1, 8>}, {pipeline_mode = #tpu.pipeline_mode<synchronous>, transform_indices = @transform_9, window_bounds = array<i64: 1, 8>}, {transform_indices = @transform_10, window_bounds = array<i64: 8, 8>}, {transform_indices = @transform_11, window_bounds = array<i64: 8, 16>}]} {
    %c0 = arith.constant 0 : index
    %c0_0 = arith.constant 0 : index
    %0 = vector.load %arg1[%c0, %c0_0] : memref<8x16xf32, #tpu.memory_space<vmem>>, vector<8x16xf32>
    %c0_1 = arith.constant 0 : index
    %c0_2 = arith.constant 0 : index
    %1 = vector.load %arg2[%c0_1, %c0_2] : memref<16x32xf32, #tpu.memory_space<vmem>>, vector<16x32xf32>
    %cst = arith.constant dense<0.000000e+00> : vector<8x32xf32>
    %2 = tpu.matmul %0, %1, %cst {dimension_numbers = #tpu.dot_dimension_numbers<[1], [0], [0], [1], [0, 0, 1, 1], [], []>} : vector<8x16xf32>, vector<16x32xf32>, vector<8x32xf32> -> vector<8x32xf32>
    %c0_3 = arith.constant 0 : index
    %c0_4 = arith.constant 0 : index
    %3 = vector.load %arg3[%c0_3, %c0_4] : memref<1x32xf32, #tpu.memory_space<vmem>>, vector<1x32xf32>
    %4 = vector.broadcast %3 : vector<1x32xf32> to vector<8x32xf32>
    %5 = arith.addf %2, %4 : vector<8x32xf32>
    %cst_5 = arith.constant 0.000000e+00 : f32
    %6 = vector.broadcast %cst_5 : f32 to vector<8x32xf32>
    %7 = arith.maximumf %5, %6 : vector<8x32xf32>
    %c0_6 = arith.constant 0 : index
    %c0_7 = arith.constant 0 : index
    %8 = vector.load %arg4[%c0_6, %c0_7] : memref<32x32xf32, #tpu.memory_space<vmem>>, vector<32x32xf32>
    %cst_8 = arith.constant dense<0.000000e+00> : vector<8x32xf32>
    %9 = tpu.matmul %7, %8, %cst_8 {dimension_numbers = #tpu.dot_dimension_numbers<[1], [0], [0], [1], [0, 0, 1, 1], [], []>} : vector<8x32xf32>, vector<32x32xf32>, vector<8x32xf32> -> vector<8x32xf32>
    %c0_9 = arith.constant 0 : index
    %c0_10 = arith.constant 0 : index
    %10 = vector.load %arg5[%c0_9, %c0_10] : memref<1x32xf32, #tpu.memory_space<vmem>>, vector<1x32xf32>
    %11 = vector.broadcast %10 : vector<1x32xf32> to vector<8x32xf32>
    %12 = arith.addf %9, %11 : vector<8x32xf32>
    %cst_11 = arith.constant 0.000000e+00 : f32
    %13 = vector.broadcast %cst_11 : f32 to vector<8x32xf32>
    %14 = arith.maximumf %12, %13 : vector<8x32xf32>
    %c0_12 = arith.constant 0 : index
    %c0_13 = arith.constant 0 : index
    %15 = vector.load %arg6[%c0_12, %c0_13] : memref<32x32xf32, #tpu.memory_space<vmem>>, vector<32x32xf32>
    %cst_14 = arith.constant dense<0.000000e+00> : vector<8x32xf32>
    %16 = tpu.matmul %14, %15, %cst_14 {dimension_numbers = #tpu.dot_dimension_numbers<[1], [0], [0], [1], [0, 0, 1, 1], [], []>} : vector<8x32xf32>, vector<32x32xf32>, vector<8x32xf32> -> vector<8x32xf32>
    %c0_15 = arith.constant 0 : index
    %c0_16 = arith.constant 0 : index
    %17 = vector.load %arg7[%c0_15, %c0_16] : memref<1x32xf32, #tpu.memory_space<vmem>>, vector<1x32xf32>
    %18 = vector.broadcast %17 : vector<1x32xf32> to vector<8x32xf32>
    %19 = arith.addf %16, %18 : vector<8x32xf32>
    %cst_17 = arith.constant 0.000000e+00 : f32
    %20 = vector.broadcast %cst_17 : f32 to vector<8x32xf32>
    %21 = arith.maximumf %19, %20 : vector<8x32xf32>
    %c0_18 = arith.constant 0 : index
    %c0_19 = arith.constant 0 : index
    %22 = vector.load %arg8[%c0_18, %c0_19] : memref<32x8xf32, #tpu.memory_space<vmem>>, vector<32x8xf32>
    %cst_20 = arith.constant dense<0.000000e+00> : vector<8x8xf32>
    %23 = tpu.matmul %21, %22, %cst_20 {dimension_numbers = #tpu.dot_dimension_numbers<[1], [0], [0], [1], [0, 0, 1, 1], [], []>} : vector<8x32xf32>, vector<32x8xf32>, vector<8x8xf32> -> vector<8x8xf32>
    %c0_21 = arith.constant 0 : index
    %c0_22 = arith.constant 0 : index
    %24 = vector.load %arg9[%c0_21, %c0_22] : memref<1x8xf32, #tpu.memory_space<vmem>>, vector<1x8xf32>
    %25 = vector.broadcast %24 : vector<1x8xf32> to vector<8x8xf32>
    %26 = arith.addf %23, %25 : vector<8x8xf32>
    %c0_23 = arith.constant 0 : index
    %c0_24 = arith.constant 0 : index
    %27 = vector.load %arg10[%c0_23, %c0_24] : memref<1x8xf32, #tpu.memory_space<vmem>>, vector<1x8xf32>
    %c0_25 = arith.constant 0 : index
    %c0_26 = arith.constant 0 : index
    %28 = vector.load %arg11[%c0_25, %c0_26] : memref<8x8xf32, #tpu.memory_space<vmem>>, vector<8x8xf32>
    %29 = vector.broadcast %27 : vector<1x8xf32> to vector<8x8xf32>
    %30 = arith.mulf %29, %28 : vector<8x8xf32>
    %31 = arith.addf %26, %30 : vector<8x8xf32>
    %cst_27 = arith.constant -1.000000e+00 : f32
    %cst_28 = arith.constant 1.000000e+00 : f32
    %32 = vector.broadcast %cst_27 : f32 to vector<8x8xf32>
    %33 = arith.maximumf %32, %31 : vector<8x8xf32>
    %34 = vector.broadcast %cst_28 : f32 to vector<8x8xf32>
    %35 = arith.minimumf %34, %33 : vector<8x8xf32>
    %c0_29 = arith.constant 0 : index
    %c0_30 = arith.constant 0 : index
    %36 = vector.load %arg12[%c0_29, %c0_30] : memref<8x16xf32, #tpu.memory_space<vmem>>, vector<8x8xf32>
    tpu.vector_store %arg12[%c0_29, %c0_30], %35 {strides = array<i32>} : memref<8x16xf32, #tpu.memory_space<vmem>>, vector<8x8xf32>,
    %c0_31 = arith.constant 0 : index
    %c8 = arith.constant 8 : index
    %37 = vector.load %arg12[%c0_31, %c8] : memref<8x16xf32, #tpu.memory_space<vmem>>, vector<8x8xf32>
    tpu.vector_store %arg12[%c0_31, %c8], %26 {strides = array<i32>} : memref<8x16xf32, #tpu.memory_space<vmem>>, vector<8x8xf32>,
    return
  }
  func.func @transform_0(%arg0: i32) -> (i32, i32) {
    %c0_i32 = arith.constant 0 : i32
    %c0_i32_0 = arith.constant 0 : i32
    return %arg0, %c0_i32 : i32, i32
  }
  func.func @transform_1(%arg0: i32) -> (i32, i32) {
    %c0_i32 = arith.constant 0 : i32
    %c0_i32_0 = arith.constant 0 : i32
    %c0_i32_1 = arith.constant 0 : i32
    return %c0_i32, %c0_i32_0 : i32, i32
  }
  func.func @transform_2(%arg0: i32) -> (i32, i32) {
    %c0_i32 = arith.constant 0 : i32
    %c0_i32_0 = arith.constant 0 : i32
    %c0_i32_1 = arith.constant 0 : i32
    return %c0_i32, %c0_i32_0 : i32, i32
  }
  func.func @transform_3(%arg0: i32) -> (i32, i32) {
    %c0_i32 = arith.constant 0 : i32
    %c0_i32_0 = arith.constant 0 : i32
    %c0_i32_1 = arith.constant 0 : i32
    return %c0_i32, %c0_i32_0 : i32, i32
  }
  func.func @transform_4(%arg0: i32) -> (i32, i32) {
    %c0_i32 = arith.constant 0 : i32
    %c0_i32_0 = arith.constant 0 : i32
    %c0_i32_1 = arith.constant 0 : i32
    return %c0_i32, %c0_i32_0 : i32, i32
  }
  func.func @transform_5(%arg0: i32) -> (i32, i32) {
    %c0_i32 = arith.constant 0 : i32
    %c0_i32_0 = arith.constant 0 : i32
    %c0_i32_1 = arith.constant 0 : i32
    return %c0_i32, %c0_i32_0 : i32, i32
  }
  func.func @transform_6(%arg0: i32) -> (i32, i32) {
    %c0_i32 = arith.constant 0 : i32
    %c0_i32_0 = arith.constant 0 : i32
    %c0_i32_1 = arith.constant 0 : i32
    return %c0_i32, %c0_i32_0 : i32, i32
  }
  func.func @transform_7(%arg0: i32) -> (i32, i32) {
    %c0_i32 = arith.constant 0 : i32
    %c0_i32_0 = arith.constant 0 : i32
    %c0_i32_1 = arith.constant 0 : i32
    return %c0_i32, %c0_i32_0 : i32, i32
  }
  func.func @transform_8(%arg0: i32) -> (i32, i32) {
    %c0_i32 = arith.constant 0 : i32
    %c0_i32_0 = arith.constant 0 : i32
    %c0_i32_1 = arith.constant 0 : i32
    return %c0_i32, %c0_i32_0 : i32, i32
  }
  func.func @transform_9(%arg0: i32) -> (i32, i32) {
    %c0_i32 = arith.constant 0 : i32
    %c0_i32_0 = arith.constant 0 : i32
    %c0_i32_1 = arith.constant 0 : i32
    return %c0_i32, %c0_i32_0 : i32, i32
  }
  func.func @transform_10(%arg0: i32) -> (i32, i32) {
    %c0_i32 = arith.constant 0 : i32
    %c0_i32_0 = arith.constant 0 : i32
    return %arg0, %c0_i32 : i32, i32
  }
  func.func @transform_11(%arg0: i32) -> (i32, i32) {
    %c0_i32 = arith.constant 0 : i32
    %c0_i32_0 = arith.constant 0 : i32
    return %arg0, %c0_i32 : i32, i32
  }
}

</mosaic_0001>

<bundles_post_ra>
// kernel: tpu_custom_call.1
= control target key start
LH: loop header
LB: loop body
LE: loop exit
PB: predicated region body
PF: predicated region fallthrough
CT: control target
= control target key end

     0   :  { %s1529_s0 = inlined_call_operand.hbm [shape: f32[16,16], index: 0, kind: input, shape index: {}]   ;;  %s1530_s1 = inlined_call_operand.hbm [shape: f32[16,32], index: 1, kind: input, shape index: {}]   ;;  %s1531_s2 = inlined_call_operand.vmem [shape: f32[1,32], index: 2, kind: input, shape index: {}]   ;;  %s1532_s3 = inlined_call_operand.vmem [shape: f32[32,32], index: 3, kind: input, shape index: {}]   ;;  %s1533_s4 = inlined_call_operand.vmem [shape: f32[1,32], index: 4, kind: input, shape index: {}]   ;;  %s1534_s5 = inlined_call_operand.vmem [shape: f32[32,32], index: 5, kind: input, shape index: {}]   ;;  %s1535_s6 = inlined_call_operand.vmem [shape: f32[1,32], index: 6, kind: input, shape index: {}]   ;;  %s1536_s7 = inlined_call_operand.vmem [shape: f32[32,8], index: 7, kind: input, shape index: {}]   ;;  %s1537_s8 = inlined_call_operand.vmem [shape: f32[1,8], index: 8, kind: input, shape index: {}]   ;;  %s1538_s9 = inlined_call_operand.vmem [shape: f32[1,8], index: 9, kind: input, shape index: {}]   ;;  %s1539_s10 = inlined_call_operand.vmem [shape: f32[16,8], index: 10, kind: input, shape index: {}]   ;;  %s1540_s11 = inlined_call_operand.hbm [shape: f32[16,16], index: 11, kind: output, shape index: {}]  }
   0x1   :  { %1549 = sst [smem:[#allocation14_spill]] %s1540_s11 }
   0x2   :  { %16 = vsyncpa [#allocation3], 0 }
   0x3   :  { %18 = vsyncpa [#allocation3 + $0x1], 0 }
   0x4   :  { %19 = vsyncpa [#allocation6], 0 }
   0x5   :  { %20 = vsyncpa [#allocation4], 0 }
   0x6   :  { %22 = vsyncpa [#allocation4 + $0x1], 0  ;;  %s1266_s17 = smov 0   ;;  %s1268_s18 = smov 0  }
   0x7   :  { %s1270_s19 = smov 0   ;;  %s1272_s20 = smov 0  }
   0x8 LB: > { %1550 = sst [smem:[#allocation11_spill]] %s1183_s17  ;;  %s1287_s21 = sadd.s32 4294967295, %s1195_s20   ;;  %s1195_s20 = sphi %s1272_s20, %s1570_s20   ;;  %s1191_s19 = sphi %s1270_s19, %s1573_s19   ;;  %s1187_s18 = sphi %s1268_s18, %s1572_s18   ;;  %s1183_s17 = sphi %s1266_s17, %s1571_s17  }
   0x9   : > { %s900_s22 = sadd.s32 4294967294, %s1195_s20   ;;  %p48_p0 = scmp.ne.s32.totalorder %s1187_s18, %s1183_s17 }
   0xa   : > { %p1544_p1 = scmp.eq.s32.totalorder %s1287_s21, 0  ;;  %p293_p3 = scmp.eq.s32.totalorder %s900_s22, 1 }
   0xb   : > { %p901_p5 = scmp.ge.s32.totalorder %s1195_s20, 1  ;;  %p300_p7 = scmp.lt.s32.totalorder %s1195_s20, 3 }
   0xc   : > { %p1296_p4 = por %p1544_p1, %p48_p0  ;;  %p1301_p6 = por %p293_p3, %p48_p0 }
   0xd   : > { %p1306_p8 = pnand %p901_p5, %p300_p7  ;;  %s1197_s26 = smov [#allocation5]  }
   0xe   : > { %s1551_s23 = scalar_select %p1296_p4, 1, 0 }
   0xf   : > { %s1552_s24 = scalar_select %p1301_p6, 1, 0 }
  0x10   : > { %s1554_s25 = scalar_select %p1306_p8, 1, 0 }
  0x11   : > { %1553 = sst [smem:[#allocation12_spill]] %s1552_s24  ;;  %s312_s27 = sshll.u32 %s1197_s26, 4  ;;  %s1310_s27 = int_to_ptr.vmem [resolvable:$true] %s312_s27 }
  0x12   : > { %p1012_p9 = pneg %p1306_p8  ;;  %s1322_s29 = sadd.s32 1, %s1195_s20  }
  0x13   : > { %1556 = sst [smem:[#allocation13_spill]] %s1322_s29  ;;  %s35_s30 = sadd.s32 1, %s1191_s19 }
  0x14   : > { %p1317_p11 = pnand %p1012_p9, %p1544_p1  ;;  %s32_s12 = ssub.s32 %s1195_s20, %s1322_s29 }
  0x15   : > { %s1067_s15 = scalar_lea.hbm %s1530_s1, 256 }
  0x16   : > { %p1068_p12 = scmp.ne.s32.totalorder %s1530_s1, %s1067_s15  ;;  %p1069_p13 = pneg %p1317_p11 }
  0x17   : > { %p1074_p5 = scmp.lt.u32.totalorder %s1067_s15, %s1530_s1 }
  0x18   : > { %p1070_p0 = pnand %p1069_p13, %p1068_p12 }
  0x1a   : > { %p1071_p3 = pneg %p1070_p0 }
  0x1c   : > { %p1076_p7 = pnand %p1074_p5, %p1071_p3 }
  0x1e   : > { %1079 = shalt.err (!%p1076_p7)
}
  0x1f   : > { %s1080_s29 = scalar_lea.vmem %s1310_s27, 256  ;;  %p1088_p2 = scmp.lt.s32.totalorder %s1310_s27, %s1310_s27 }
  0x20   : > { %p1081_p9 = scmp.ne.s32.totalorder %s1310_s27, %s1080_s29  ;;  %p1089_p6 = scmp.lt.s32.totalorder %s1080_s29, %s1080_s29 }
  0x22   : > { %p1083_p10 = pnand %p1081_p9, %p1069_p13  ;;  %p1090_p4 = por %p1089_p6, %p1088_p2 }
  0x24   : > { %p1084_p1 = pneg %p1083_p10 }
  0x26   : > { %p1091_p8 = pnand %p1090_p4, %p1084_p1 }
  0x28   : > { %1094 = shalt.err (!%p1091_p8)
}
  0x29   : > { %s1198_s13 = smov 128   ;;  %s1199_s24 = smov 8  }
  0x2a   : > { %1015 = dma.hbm_to_vmem [thread:$0]  (!%p1317_p11), %s1530_s1, 256, %s1310_s27, [#allocation6], %s1198_s13, %s1198_s13, %s1199_s24  }
  0x2b   : > { %p33_p2 = scmp.eq.s32.totalorder %s32_s12, 0  ;;  %p42_p1 = scmp.ne.s32.totalorder %s1191_s19, %s1187_s18 }
  0x2c   : > { %p43_p4 = scmp.eq.s32.totalorder %s1195_s20, 0  ;;  %p1025_p6 = scmp.lt.s32.totalorder %s1195_s20, 2 }
  0x2d   : > { %s1353_s29 = scalar_select %p33_p2, %s1191_s19, %s35_s30  }
  0x2e   : > { %p44_p8 = por %p43_p4, %p42_p1  ;;  %p1557_p10 = scmp.eq.s32.totalorder %s1287_s21, 1 }
  0x2f   : > { %s350_s22 = sand.u32 1, %s1191_s19   ;;  %s905_s26 = sshll.u32 %s1195_s20, 7 }
  0x30   : > { %p1357_p12 = por %p1557_p10, %p42_p1  ;;  %s904_s17 = sshll.u32 %s350_s22, 3 }
  0x31   : > { %s1366_s14 = scalar_lea.hbm %s1529_s0, %s905_s26  ;;  %s354_s27 = scalar_lea.vmem [#allocation2], %s904_s17 }
  0x32   : > { %s361_s30 = sshll.u32 %s354_s27, 4  ;;  %p1368_p11 = pnand %p1025_p6, %p44_p8  ;;  %s1372_s30 = int_to_ptr.vmem [resolvable:$true] %s361_s30 }
  0x33   : > { %s351_s13 = scalar_lea.sflag [#allocation3], %s350_s22  ;;  %s1095_s24 = scalar_lea.hbm %s1366_s14, 128 }
  0x34   : > { %p1096_p13 = scmp.ne.s32.totalorder %s1366_s14, %s1095_s24  ;;  %p1097_p0 = pneg %p1368_p11 }
  0x35   : > { %s1100_s15 = scalar_lea.hbm %s1529_s0, 256  ;;  %p1101_p7 = scmp.lt.u32.totalorder %s1366_s14, %s1529_s0 }
  0x36   : > { %p1098_p3 = pnand %p1097_p0, %p1096_p13  ;;  %p1102_p9 = scmp.lt.u32.totalorder %s1100_s15, %s1095_s24 }
  0x37   : > { %p1104_p1 = scmp.lt.u32.totalorder %s1095_s24, %s1366_s14 }
  0x38   : > { %p1099_p5 = pneg %p1098_p3  ;;  %p1103_p2 = por %p1102_p9, %p1101_p7 }
  0x3a   : > { %p1105_p4 = por %p1104_p1, %p1103_p2 }
  0x3c   : > { %p1106_p6 = pnand %p1105_p4, %p1099_p5 }
  0x3e   : > { %1109 = shalt.err (!%p1106_p6)
}
  0x3f   : > { %s1110_s22 = scalar_lea.vmem %s1372_s30, 128  ;;  %s1200_s27 = smov [#allocation2]  }
  0x40   : > { %p1111_p8 = scmp.ne.s32.totalorder %s1372_s30, %s1110_s22  ;;  %s1115_s11 = sshll.u32 %s1200_s27, 4  ;;  %s1116_s11 = int_to_ptr.vmem [resolvable:$false] %s1115_s11 }
  0x41   : > { %s1117_s17 = scalar_lea.vmem %s1116_s11, 256  ;;  %p1118_p3 = scmp.lt.s32.totalorder %s1372_s30, %s1116_s11 }
  0x42   : > { %p1113_p10 = pnand %p1111_p8, %p1097_p0  ;;  %p1119_p7 = scmp.lt.s32.totalorder %s1117_s17, %s1110_s22 }
  0x44   : > { %p1114_p13 = pneg %p1113_p10  ;;  %p1120_p9 = por %p1119_p7, %p1118_p3 }
  0x46   : > { %p1121_p2 = pnand %p1120_p9, %p1114_p13 }
  0x48   : > { %1124 = shalt.err (!%p1121_p2)
}
  0x49   : > { %1019 = dma.hbm_to_vmem [thread:$0]  (!%p1368_p11), %s1366_s14, 128, %s1372_s30, %s351_s13  }
  0x4a   : > { %p1560_p5 = scmp.ne.s32.totalorder %s1554_s25, 0 }
  0x4b   : > { %s1402_s24 = sand.u32 (!%p1560_p5), 1, %s1187_s18   ;;  %p1561_p0 = scmp.ne.s32.totalorder (!%p1560_p5), %s1551_s23, 0 }
  0x4c   : > { %377 = sbr.rel (%p1560_p5) target bundleno = 1084 (0x43c), region = 64  ;;  %s907_s15 = sshll.u32 (!%p1560_p5), %s1402_s24, 3 }
  0x4d   : > { %s380_s26 = scalar_lea.sflag (!%p1560_p5), [#allocation3], %s1402_s24  ;;  %s383_s28 = scalar_lea.vmem (!%p1560_p5), [#allocation2], %s907_s15 }
  0x53   : > { %1170 = dma.done.wait (%p1561_p0), %s380_s26, 128  }
  0x54   : > { %1172 = vsyncadd (%p1561_p0), %s380_s26, 4294967168  ;;  %p1562_p11 = scmp.eq.s32.totalorder %s1287_s21, 0 }
  0x56   : > { %1174 = dma.done.wait (%p1562_p11), [#allocation6], 256   ;;  %p1563_p1 = pmov %p1562_p11 }
  0x57   : > { %v1201_v0 = vmov 0.0|0.0   ;;  %vm1202_vm0 = vmmov 0   ;;  %v1203_v1 = vmov 0.0   ;;  %v435_v2 = vld [vmem:[#allocation5] sm:$0xff]  ;;  %v436_v3 = vld [vmem:[#allocation5 + $0x8] sm:$0xff]  ;;  %v519_v5 = vld [vmem:[%s1532_s3] sm:$0xff] }
  0x58   : > { %1176 = vsyncadd (%p1563_p1), [#allocation6], 4294967040  ;;  %983 = vmatprep.subr.bf16.mxu0 %v1201_v0  ;;  %947 = vmatprep.mubr.msk.f32.mxu0 %vm1202_vm0, %v1203_v1  ;;  %v984_v4 = vpack.c.bf16 %v436_v3, %v435_v2  ;;  %v520_v6 = vld [vmem:[%s1532_s3 + $0x8] sm:$0xff]  ;;  %vm444_vm1 = vcmask 130048   ;;  %v521_v9 = vld [vmem:[%s1532_s3 + $0x10] sm:$0xff]  ;;  %vm530_vm2 = vcmask 261120  }
  0x59   : > { %986 = vmatprep.subr.bf16.mxu1 %v1201_v0  ;;  %958 = vmatprep.mubr.msk.f32.mxu1 %vm1202_vm0, %v1203_v1  ;;  %v987_v7 = vpack.c.bf16 %v520_v6, %v519_v5  ;;  %v434_v8 = vld [vmem:[%s383_s28] sm:$0xff]  ;;  %v522_v10 = vld [vmem:[%s1532_s3 + $0x18] sm:$0xff]  ;;  %v607_v20 = vld [vmem:[%s1534_s5 + $0x10] sm:$0xff]  ;;  %p430_p4 = scmp.lt.s32.totalorder %s1287_s21, 1  ;;  %s1204_s30 = smov 8   ;;  %vm786_vm3 = vcmask 64512  }
  0x5a   : > { %985 = vmatpush3.bf16.msra.mxu0 %v984_v4  ;;  %v990_v11 = vpack.c.bf16 %v522_v10, %v521_v9  ;;  %v605_v12 = vld [vmem:[%s1534_s5] sm:$0xff]  ;;  %v606_v13 = vld [vmem:[%s1534_s5 + $0x8] sm:$0xff]  ;;  %v608_v21 = vld [vmem:[%s1534_s5 + $0x18] sm:$0xff]  ;;  %s429_s12 = scalar_lea.vmem [#allocation7], %s907_s15  ;;  %s922_s13 = sshll.u32 %s1287_s21, 7  ;;  %vm792_vm4 = vcmask 130112  }
  0x5b   : > { %988 = vmatpush3.bf16.msra.mxu1 %v987_v7  ;;  %992 = vmatprep.subr.bf16.mxu0 %v1201_v0  ;;  %v993_v14 = vpack.c.bf16 %v606_v13, %v605_v12  ;;  %v911_v15 = vld [vmem:[%s1531_s2] ss:$0 sm:$0xff]  ;;  %v996_v22 = vpack.c.bf16 %v608_v21, %v607_v20  ;;  %v691_v24 = vld [vmem:[%s1536_s7 + $0x8] sm:$0xff]  ;;  %v692_v31 = vld [vmem:[%s1536_s7 + $0x10] sm:$0xff]  ;;  %s431_s22 = scalar_select %p430_p4, %s1287_s21, 1 }
  0x5c   : > { %989 = vmatprep.subr.bf16.mxu1 %v1201_v0  ;;  %v690_v23 = vld [vmem:[%s1536_s7] sm:$0xff]  ;;  %v693_v32 = vld [vmem:[%s1536_s7 + $0x18] sm:$0xff]  ;;  %s1564_s17 = sld [smem:[#allocation14_spill]]  ;;  %s795_s23 = scalar_lea.sflag [#allocation4], %s1402_s24 }
  0x5d   : > { %948 = vmatmul.mubr.msk.f32.vlgmr.msra.gmra.mrb[0].mxu0 %vm444_vm1, %v434_v8  ;;  %v999_v25 = vpack.c.bf16 %v691_v24, %v690_v23  ;;  %v913_v26 = vld [vmem:[%s1533_s4] ss:$0 sm:$0xff]  ;;  %v1002_v33 = vpack.c.bf16 %v693_v32, %v692_v31  ;;  %s910_s27 = sshll.u32 %s431_s22, 3  ;;  %s808_s22 = sshll.u32 %s429_s12, 4  ;;  %s1487_s22 = int_to_ptr.vmem [resolvable:$true] %s808_s22 }
  0x5e   : > { %969 = vmatprep.mubr.msk.f32.mxu0 %vm1202_vm0, %v1203_v1  ;;  %994 = vmatpush3.bf16.msra.mxu0 %v993_v14  ;;  %v915_v34 = vld [vmem:[%s1535_s6] ss:$0 sm:$0xff]  ;;  %s433_s26 = scalar_lea.vmem %s1539_s10, %s910_s27  ;;  %s1125_s25 = scalar_lea.vmem %s1487_s22, 128 }
  0x5f   : > { %991 = vmatpush3.bf16.msra.mxu1 %v990_v11  ;;  %995 = vmatprep.subr.bf16.mxu0 %v1201_v0  ;;  %v919_v39 = vld [vmem:[%s1538_s9] ss:$0 sm:$0xff]  ;;  %p1126_p6 = scmp.ne.s32.totalorder %s1487_s22, %s1125_s25  ;;  %s1205_s21 = smov [#allocation7]  }
  0x60   : > { %998 = vmatprep.subr.bf16.mxu1 %v1201_v0  ;;  %v775_v40 = vld [vmem:[%s433_s26] sm:$0xff]  ;;  %s1129_s15 = sshll.u32 %s1205_s21, 4  ;;  %s1130_s15 = int_to_ptr.vmem [resolvable:$false] %s1129_s15 }
  0x61   : > { %v917_v41 = vld [vmem:[%s1537_s8] ss:$0 sm:$0xff]  ;;  %v782_v42 = vmul.f32 %v919_v39, %v775_v40  ;;  %p1127_p8 = pnand %p1126_p6, %p1357_p12  ;;  %s1131_s14 = scalar_lea.vmem %s1130_s15, 256 }
  0x62   : > { %997 = vmatpush3.bf16.msra.mxu0 %v996_v22  ;;  %s1565_s26 = smov %s1564_s17  ;;  %s1485_s28 = scalar_lea.hbm %s1564_s17, %s922_s13 }
  0x63   : > { %p1128_p10 = pneg %p1127_p8  ;;  %p1132_p13 = scmp.lt.s32.totalorder %s1487_s22, %s1130_s15 }
  0x64   : > { %p1133_p3 = scmp.lt.s32.totalorder %s1131_s14, %s1125_s25 }
  0x66   : > { %p1134_p7 = por %p1133_p3, %p1132_p13 }
  0x68   : > { %p1135_p9 = pnand %p1134_p7, %p1128_p10 }
 0x130   : > { %v514_v16 = vpop.f32.mrb[0].mxu0 }
 0x131   : > { %v515_v17 = vadd.f32 %v911_v15, %v514_v16  ;;  %v949_v18 = vpop.f32.mrb[1].mxu0 }
 0x133   : > { %v518_v19 = vmax.f32 %v515_v17, 0.0 }
 0x135   : > { %959 = vmatmul.mubr.msk.f32.vlgmr.msra.gmra.mrb[0].mxu1 %vm530_vm2, %v518_v19 }
 0x136   : > { %980 = vmatprep.mubr.msk.f32.mxu1 %vm1202_vm0, %v1203_v1  ;;  %1000 = vmatpush3.bf16.msra.mxu1 %v999_v25 }
 0x137   : > { %1001 = vmatprep.subr.bf16.mxu1 %v1201_v0 }
 0x13a   : > { %1003 = vmatpush3.bf16.msra.mxu1 %v1002_v33 }
 0x208   : > { %v600_v27 = vpop.f32.mrb[0].mxu1 }
 0x209   : > { %v601_v28 = vadd.f32 %v913_v26, %v600_v27  ;;  %v960_v29 = vpop.f32.mrb[1].mxu1 }
 0x20b   : > { %v604_v30 = vmax.f32 %v601_v28, 0.0 }
 0x20d   : > { %970 = vmatmul.mubr.msk.f32.vlgmr.msra.gmra.mrb[2].mxu0 %vm530_vm2, %v604_v30 }
 0x2e0   : > { %v685_v35 = vpop.f32.mrb[2].mxu0 }
 0x2e1   : > { %v686_v36 = vadd.f32 %v915_v34, %v685_v35  ;;  %v971_v37 = vpop.f32.mrb[3].mxu0 }
 0x2e3   : > { %v689_v38 = vmax.f32 %v686_v36, 0.0 }
 0x2e5   : > { %981 = vmatmul.mubr.msk.f32.vlgmr.msra.gmra.mrb[2].mxu1 %vm530_vm2, %v689_v38 }
 0x3b8   : > { %v770_v43 = vpop.f32.mrb[2].mxu1 }
 0x3b9   : > { %v771_v44 = vadd.f32 %v917_v41, %v770_v43  ;;  %v982_v45 = vpop.f32.mrb[3].mxu1 }
 0x3bb   : > { %v783_v46 = vadd.f32 %v782_v42, %v771_v44  ;;  %789 = vrot.lane.b32.xlu0 %v771_v44, %s1204_s30 }
 0x3bd   : > { %v920_v47 = vclamps-f32 %v783_v46, 1.0 }
 0x3bf   : > { %787 = vst.msk [vmem:[%s429_s12] sm:$0xff] %vm786_vm3, %v920_v47 }
 0x42d   : > { %v790_v48 = vpop.permute.xlu0 %789 }
 0x42e   : > { %793 = vst.msk [vmem:[%s429_s12] sm:$0xff] %vm792_vm4, %v790_v48 }
 0x42f   : > { %1138 = shalt.err (!%p1135_p9)
}
 0x430   : > { %s1139_s24 = scalar_lea.hbm %s1485_s28, 128  ;;  %s1143_s13 = scalar_lea.hbm %s1565_s26, 256 }
 0x431   : > { %p1140_p2 = scmp.ne.s32.totalorder %s1485_s28, %s1139_s24  ;;  %p1144_p11 = scmp.lt.u32.totalorder %s1485_s28, %s1565_s26 }
 0x432   : > { %p1145_p1 = scmp.lt.u32.totalorder %s1143_s13, %s1139_s24  ;;  %p1147_p6 = scmp.lt.u32.totalorder %s1139_s24, %s1485_s28 }
 0x433   : > { %p1141_p5 = pnand %p1140_p2, %p1357_p12 }
 0x434   : > { %p1146_p4 = por %p1145_p1, %p1144_p11 }
 0x435   : > { %p1142_p0 = pneg %p1141_p5 }
 0x436   : > { %p1148_p8 = por %p1147_p6, %p1146_p4 }
 0x438   : > { %p1149_p10 = pnand %p1148_p8, %p1142_p0 }
 0x43a   : > { %1152 = shalt.err (!%p1149_p10)
}
 0x43b   : > { %1010 = dma.vmem_to_hbm [thread:$0]  (%p1357_p12), %s1487_s22, 128, %s1485_s28, %s795_s23  }
 0x43c PF: > { %s1566_s17 = sld [smem:[#allocation11_spill]]  ;;  %s1567_s25 = sld [smem:[#allocation12_spill]] }
 0x43d   : > { %p1569_p3 = scmp.ge.s32.totalorder %s1195_s20, 2 }
 0x442   : > { %s820_s21 = sand.u32 1, %s1566_s17   ;;  %p1568_p13 = scmp.ne.s32.totalorder %s1567_s25, 0 }
 0x443   : > { %s821_s15 = scalar_lea.sflag [#allocation4], %s820_s21 }
 0x444   : > { %p1021_p7 = pnand %p1569_p3, %p1568_p13 }
 0x446   : > { %1178 = dma.done.wait (!%p1021_p7), %s821_s15, 128  }
 0x447   : > { %1180 = vsyncadd (!%p1021_p7), %s821_s15, 4294967168  ;;  %s1570_s20 = sld [smem:[#allocation13_spill]]  ;;  %s1571_s17 = smov %s1187_s18 }
 0x448   : > { %s1572_s18 = smov %s1191_s19  ;;  %s1573_s19 = smov %s1353_s29 }
 0x44d   : > { %p25_p9 = scmp.ge.s32.totalorder %s1570_s20, 4  }
 0x44f   :  { %27 = sbr.rel (!%p25_p9) target bundleno = 8 (0x8), region = 116 }
 0x456   :  { %826 = vsyncpa [#allocation3], 1 }
 0x457   :  { %828 = vsyncpa [#allocation3 + $0x1], 1 }
 0x458   :  { %829 = vsyncpa [#allocation6], 1 }
 0x459   :  { %830 = vsyncpa [#allocation4], 1 }
 0x45a   :  { %832 = vsyncpa [#allocation4 + $0x1], 1 }

</bundles_post_ra>
